<compile_context>
chip_gen: v6e
topology: v6e:2x2x1
jax: 0.10.0
libtpu: 0.0.40
codegen_flags: <defaults>
</compile_context>

<pallas_src>
import jax
import jax.numpy as jnp
from jax.experimental import pallas as pl
from jax.experimental.pallas import tpu as pltpu


def mlp_kernel(x_ref,
               w1_ref, b1_ref,
               w2_ref, b2_ref,
               w3_ref, b3_ref,
               w4_ref, b4_ref,
               o_ref):
    """Fused 4-layer MLP on one batch tile.

    x_ref : (TB, in_p)        (in_p a multiple of 128)
    wK_ref: (inK_p, outK_p)   bK_ref: (1, outK_p)  (f32)
    o_ref : (TB, out_p)       (out_p a multiple of 128)
    """
    x = x_ref[...]

    h = jnp.dot(x, w1_ref[...], preferred_element_type=jnp.float32) + b1_ref[...]
    h = jnp.maximum(h, 0.0).astype(w2_ref.dtype)

    h = jnp.dot(h, w2_ref[...], preferred_element_type=jnp.float32) + b2_ref[...]
    h = jnp.maximum(h, 0.0).astype(w3_ref.dtype)

    h = jnp.dot(h, w3_ref[...], preferred_element_type=jnp.float32) + b3_ref[...]
    h = jnp.maximum(h, 0.0).astype(w4_ref.dtype)

    out = jnp.dot(h, w4_ref[...], preferred_element_type=jnp.float32) + b4_ref[...]
    o_ref[...] = out.astype(o_ref.dtype)


def _round_up(n, m):
    return ((n + m - 1) // m) * m


def mlp_forward(x, params, *, tile_b=256, compute_dtype=None):
    """Run the fused MLP kernel.

    x            : (B, input_size) float32
    params       : [(w1,b1),...,(w4,b4)] with wK (in,out), bK (1,out)
    tile_b       : batch tile (rows per grid step); must be a multiple of 8.
    compute_dtype: None (f32 matmuls) or jnp.bfloat16 (bf16 in, f32 accumulate).
    """
    (w1, b1), (w2, b2), (w3, b3), (w4, b4) = params
    B, input_size = x.shape
    h1, h2, h3 = w1.shape[1], w2.shape[1], w3.shape[1]
    output_size = w4.shape[1]
    assert tile_b % 8 == 0, "tile_b must be a multiple of 8 (sublane granularity)"

    LANE = 128
    in_p = _round_up(input_size, LANE)
    h1_p = _round_up(h1, LANE)
    h2_p = _round_up(h2, LANE)
    h3_p = _round_up(h3, LANE)
    out_p = _round_up(output_size, LANE)

    # Batch tiling: one grid step for small batches, else tile_b-row tiles.
    # (round to 16 so bf16 second-minor tiling is also satisfied)
    b_pad = _round_up(B, 16)
    if b_pad <= tile_b:
        tb = b_pad
    else:
        tb = tile_b
        b_pad = _round_up(B, tile_b)

    def pad2(a, r, c):
        return jnp.pad(a, ((0, r - a.shape[0]), (0, c - a.shape[1])))

    xp = pad2(x, b_pad, in_p)
    w1p, b1p = pad2(w1, in_p, h1_p), pad2(b1, 1, h1_p)
    w2p, b2p = pad2(w2, h1_p, h2_p), pad2(b2, 1, h2_p)
    w3p, b3p = pad2(w3, h2_p, h3_p), pad2(b3, 1, h3_p)
    w4p, b4p = pad2(w4, h3_p, out_p), pad2(b4, 1, out_p)

    if compute_dtype is not None:
        xp = xp.astype(compute_dtype)
        w1p, w2p, w3p, w4p = (w.astype(compute_dtype)
                              for w in (w1p, w2p, w3p, w4p))
    # Biases always f32: added to the f32 accumulator.
    b1p, b2p, b3p, b4p = (b.astype(jnp.float32) for b in (b1p, b2p, b3p, b4p))

    # Weights/biases are small and constant across the grid -> single full
    # block resident in VMEM for the whole kernel; only the batch axis tiles.
    # (~200-400 KB total; single-buffering them would be a marginal VMEM win.)
    def full_spec(arr):
        return pl.BlockSpec(arr.shape, lambda i: (0, 0))

    grid = (b_pad // tb,)
    out = pl.pallas_call(
        mlp_kernel,
        out_shape=jax.ShapeDtypeStruct((b_pad, out_p), jnp.float32),
        grid_spec=pltpu.PrefetchScalarGridSpec(
            num_scalar_prefetch=0,
            grid=grid,
            in_specs=[
                pl.BlockSpec((tb, in_p), lambda i: (i, 0)),
                full_spec(w1p), full_spec(b1p),
                full_spec(w2p), full_spec(b2p),
                full_spec(w3p), full_spec(b3p),
                full_spec(w4p), full_spec(b4p),
            ],
            out_specs=pl.BlockSpec((tb, out_p), lambda i: (i, 0)),
        ),
        compiler_params=pltpu.CompilerParams(
            dimension_semantics=("parallel",)),
    )(xp, w1p, b1p, w2p, b2p, w3p, b3p, w4p, b4p)

    # Strip batch + output-lane padding.
    return out[:B, :output_size].astype(x.dtype)


def init_mlp_params(key, input_size, output_size, hidden_sizes=(256, 128, 64)):
    """Deterministic init mirroring nn.Linear's U(-1/sqrt(in), 1/sqrt(in)).
    Weights returned pre-transposed as (in, out); biases as (1, out)."""
    sizes = [input_size] + list(hidden_sizes) + [output_size]
    params = []
    for in_f, out_f in zip(sizes[:-1], sizes[1:]):
        key, kw, kb = jax.random.split(key, 3)
        bound = 1.0 / (in_f ** 0.5)
        w = jax.random.uniform(kw, (in_f, out_f), jnp.float32, -bound, bound)
        b = jax.random.uniform(kb, (1, out_f), jnp.float32, -bound, bound)
        params.append((w, b))
    return params


def mlp_reference(x, params):
    """Pure-JAX reference of the same forward pass (for sanity checking)."""
    (w1, b1), (w2, b2), (w3, b3), (w4, b4) = params
    h = jnp.maximum(x @ w1 + b1, 0.0)
    h = jnp.maximum(h @ w2 + b2, 0.0)
    h = jnp.maximum(h @ w3 + b3, 0.0)
    return h @ w4 + b4


if __name__ == "__main__":
    key = jax.random.PRNGKey(0)
    key, kx, kx2 = jax.random.split(key, 3)

    input_size = 32      # e.g. flattened sliding-tiles board features
    output_size = 8
    hidden_sizes = (256, 128, 64)
    params = init_mlp_params(key, input_size, output_size, hidden_sizes)

    # --- small batch: single grid step, no pipeline overhead (f32 path) ---
    batch = 16
    x = jax.random.normal(kx, (batch, input_size), jnp.float32)
    out = jax.block_until_ready(mlp_forward(x, params))
    ref = mlp_reference(x, params)
    assert out.shape == (batch, output_size)
    assert jnp.allclose(out, ref, atol=1e-4, rtol=1e-4), "f32 mismatch vs reference"

    # --- larger batch: tiled grid (tile_b=256), bf16 MXU path, f32 accumulate ---
    batch2 = 512
    x2 = jax.random.normal(kx2, (batch2, input_size), jnp.float32)
    out2 = jax.block_until_ready(
        mlp_forward(x2, params, tile_b=256, compute_dtype=jnp.bfloat16))
    ref2 = mlp_reference(x2, params)
    assert out2.shape == (batch2, output_size)
    assert jnp.allclose(out2, ref2, atol=5e-2, rtol=5e-2), "bf16 mismatch vs reference"

    print("KERNEL_OK")
</pallas_src>

<mosaic_0001>
module attributes {stable_mosaic.version = 11 : i64} {
  func.func @mlp_kernel(%arg0: i32, %arg1: memref<16x128xf32, #tpu.memory_space<vmem>>, %arg2: memref<128x256xf32, #tpu.memory_space<vmem>>, %arg3: memref<1x256xf32, #tpu.memory_space<vmem>>, %arg4: memref<256x128xf32, #tpu.memory_space<vmem>>, %arg5: memref<1x128xf32, #tpu.memory_space<vmem>>, %arg6: memref<128x128xf32, #tpu.memory_space<vmem>>, %arg7: memref<1x128xf32, #tpu.memory_space<vmem>>, %arg8: memref<128x128xf32, #tpu.memory_space<vmem>>, %arg9: memref<1x128xf32, #tpu.memory_space<vmem>>, %arg10: memref<16x128xf32, #tpu.memory_space<vmem>>) attributes {dimension_semantics = [#tpu.dimension_semantics<parallel>], iteration_bounds = array<i64: 1>, scalar_prefetch = 0 : i64, scratch_operands = 0 : i64, tpu.core_type = #tpu.core_type<tc>, window_params = [{transform_indices = @transform_0, window_bounds = array<i64: 16, 128>}, {pipeline_mode = #tpu.pipeline_mode<synchronous>, transform_indices = @transform_1, window_bounds = array<i64: 128, 256>}, {pipeline_mode = #tpu.pipeline_mode<synchronous>, transform_indices = @transform_2, window_bounds = array<i64: 1, 256>}, {pipeline_mode = #tpu.pipeline_mode<synchronous>, transform_indices = @transform_3, window_bounds = array<i64: 256, 128>}, {pipeline_mode = #tpu.pipeline_mode<synchronous>, transform_indices = @transform_4, window_bounds = array<i64: 1, 128>}, {pipeline_mode = #tpu.pipeline_mode<synchronous>, transform_indices = @transform_5, window_bounds = array<i64: 128, 128>}, {pipeline_mode = #tpu.pipeline_mode<synchronous>, transform_indices = @transform_6, window_bounds = array<i64: 1, 128>}, {pipeline_mode = #tpu.pipeline_mode<synchronous>, transform_indices = @transform_7, window_bounds = array<i64: 128, 128>}, {pipeline_mode = #tpu.pipeline_mode<synchronous>, transform_indices = @transform_8, window_bounds = array<i64: 1, 128>}, {transform_indices = @transform_9, window_bounds = array<i64: 16, 128>}]} {
    %c0 = arith.constant 0 : index
    %c0_0 = arith.constant 0 : index
    %0 = vector.load %arg1[%c0, %c0_0] : memref<16x128xf32, #tpu.memory_space<vmem>>, vector<16x128xf32>
    %c0_1 = arith.constant 0 : index
    %c0_2 = arith.constant 0 : index
    %1 = vector.load %arg2[%c0_1, %c0_2] : memref<128x256xf32, #tpu.memory_space<vmem>>, vector<128x256xf32>
    %cst = arith.constant dense<0.000000e+00> : vector<16x256xf32>
    %2 = tpu.matmul %0, %1, %cst {dimension_numbers = #tpu.dot_dimension_numbers<[1], [0], [0], [1], [0, 0, 1, 1], [], []>} : vector<16x128xf32>, vector<128x256xf32>, vector<16x256xf32> -> vector<16x256xf32>
    %c0_3 = arith.constant 0 : index
    %c0_4 = arith.constant 0 : index
    %3 = vector.load %arg3[%c0_3, %c0_4] : memref<1x256xf32, #tpu.memory_space<vmem>>, vector<1x256xf32>
    %4 = vector.broadcast %3 : vector<1x256xf32> to vector<16x256xf32>
    %5 = arith.addf %2, %4 : vector<16x256xf32>
    %cst_5 = arith.constant 0.000000e+00 : f32
    %6 = vector.broadcast %cst_5 : f32 to vector<16x256xf32>
    %7 = arith.maximumf %5, %6 : vector<16x256xf32>
    %c0_6 = arith.constant 0 : index
    %c0_7 = arith.constant 0 : index
    %8 = vector.load %arg4[%c0_6, %c0_7] : memref<256x128xf32, #tpu.memory_space<vmem>>, vector<256x128xf32>
    %cst_8 = arith.constant dense<0.000000e+00> : vector<16x128xf32>
    %9 = tpu.matmul %7, %8, %cst_8 {dimension_numbers = #tpu.dot_dimension_numbers<[1], [0], [0], [1], [0, 0, 1, 1], [], []>} : vector<16x256xf32>, vector<256x128xf32>, vector<16x128xf32> -> vector<16x128xf32>
    %c0_9 = arith.constant 0 : index
    %c0_10 = arith.constant 0 : index
    %10 = vector.load %arg5[%c0_9, %c0_10] : memref<1x128xf32, #tpu.memory_space<vmem>>, vector<1x128xf32>
    %11 = vector.broadcast %10 : vector<1x128xf32> to vector<16x128xf32>
    %12 = arith.addf %9, %11 : vector<16x128xf32>
    %cst_11 = arith.constant 0.000000e+00 : f32
    %13 = vector.broadcast %cst_11 : f32 to vector<16x128xf32>
    %14 = arith.maximumf %12, %13 : vector<16x128xf32>
    %c0_12 = arith.constant 0 : index
    %c0_13 = arith.constant 0 : index
    %15 = vector.load %arg6[%c0_12, %c0_13] : memref<128x128xf32, #tpu.memory_space<vmem>>, vector<128x128xf32>
    %cst_14 = arith.constant dense<0.000000e+00> : vector<16x128xf32>
    %16 = tpu.matmul %14, %15, %cst_14 {dimension_numbers = #tpu.dot_dimension_numbers<[1], [0], [0], [1], [0, 0, 1, 1], [], []>} : vector<16x128xf32>, vector<128x128xf32>, vector<16x128xf32> -> vector<16x128xf32>
    %c0_15 = arith.constant 0 : index
    %c0_16 = arith.constant 0 : index
    %17 = vector.load %arg7[%c0_15, %c0_16] : memref<1x128xf32, #tpu.memory_space<vmem>>, vector<1x128xf32>
    %18 = vector.broadcast %17 : vector<1x128xf32> to vector<16x128xf32>
    %19 = arith.addf %16, %18 : vector<16x128xf32>
    %cst_17 = arith.constant 0.000000e+00 : f32
    %20 = vector.broadcast %cst_17 : f32 to vector<16x128xf32>
    %21 = arith.maximumf %19, %20 : vector<16x128xf32>
    %c0_18 = arith.constant 0 : index
    %c0_19 = arith.constant 0 : index
    %22 = vector.load %arg8[%c0_18, %c0_19] : memref<128x128xf32, #tpu.memory_space<vmem>>, vector<128x128xf32>
    %cst_20 = arith.constant dense<0.000000e+00> : vector<16x128xf32>
    %23 = tpu.matmul %21, %22, %cst_20 {dimension_numbers = #tpu.dot_dimension_numbers<[1], [0], [0], [1], [0, 0, 1, 1], [], []>} : vector<16x128xf32>, vector<128x128xf32>, vector<16x128xf32> -> vector<16x128xf32>
    %c0_21 = arith.constant 0 : index
    %c0_22 = arith.constant 0 : index
    %24 = vector.load %arg9[%c0_21, %c0_22] : memref<1x128xf32, #tpu.memory_space<vmem>>, vector<1x128xf32>
    %25 = vector.broadcast %24 : vector<1x128xf32> to vector<16x128xf32>
    %26 = arith.addf %23, %25 : vector<16x128xf32>
    %c0_23 = arith.constant 0 : index
    %c0_24 = arith.constant 0 : index
    %27 = vector.load %arg10[%c0_23, %c0_24] : memref<16x128xf32, #tpu.memory_space<vmem>>, vector<16x128xf32>
    tpu.vector_store %arg10[%c0_23, %c0_24], %26 {strides = array<i32>} : memref<16x128xf32, #tpu.memory_space<vmem>>, vector<16x128xf32>,
    return
  }
  func.func @transform_0(%arg0: i32) -> (i32, i32) {
    %c0_i32 = arith.constant 0 : i32
    %c0_i32_0 = arith.constant 0 : i32
    return %arg0, %c0_i32 : i32, i32
  }
  func.func @transform_1(%arg0: i32) -> (i32, i32) {
    %c0_i32 = arith.constant 0 : i32
    %c0_i32_0 = arith.constant 0 : i32
    %c0_i32_1 = arith.constant 0 : i32
    return %c0_i32, %c0_i32_0 : i32, i32
  }
  func.func @transform_2(%arg0: i32) -> (i32, i32) {
    %c0_i32 = arith.constant 0 : i32
    %c0_i32_0 = arith.constant 0 : i32
    %c0_i32_1 = arith.constant 0 : i32
    return %c0_i32, %c0_i32_0 : i32, i32
  }
  func.func @transform_3(%arg0: i32) -> (i32, i32) {
    %c0_i32 = arith.constant 0 : i32
    %c0_i32_0 = arith.constant 0 : i32
    %c0_i32_1 = arith.constant 0 : i32
    return %c0_i32, %c0_i32_0 : i32, i32
  }
  func.func @transform_4(%arg0: i32) -> (i32, i32) {
    %c0_i32 = arith.constant 0 : i32
    %c0_i32_0 = arith.constant 0 : i32
    %c0_i32_1 = arith.constant 0 : i32
    return %c0_i32, %c0_i32_0 : i32, i32
  }
  func.func @transform_5(%arg0: i32) -> (i32, i32) {
    %c0_i32 = arith.constant 0 : i32
    %c0_i32_0 = arith.constant 0 : i32
    %c0_i32_1 = arith.constant 0 : i32
    return %c0_i32, %c0_i32_0 : i32, i32
  }
  func.func @transform_6(%arg0: i32) -> (i32, i32) {
    %c0_i32 = arith.constant 0 : i32
    %c0_i32_0 = arith.constant 0 : i32
    %c0_i32_1 = arith.constant 0 : i32
    return %c0_i32, %c0_i32_0 : i32, i32
  }
  func.func @transform_7(%arg0: i32) -> (i32, i32) {
    %c0_i32 = arith.constant 0 : i32
    %c0_i32_0 = arith.constant 0 : i32
    %c0_i32_1 = arith.constant 0 : i32
    return %c0_i32, %c0_i32_0 : i32, i32
  }
  func.func @transform_8(%arg0: i32) -> (i32, i32) {
    %c0_i32 = arith.constant 0 : i32
    %c0_i32_0 = arith.constant 0 : i32
    %c0_i32_1 = arith.constant 0 : i32
    return %c0_i32, %c0_i32_0 : i32, i32
  }
  func.func @transform_9(%arg0: i32) -> (i32, i32) {
    %c0_i32 = arith.constant 0 : i32
    %c0_i32_0 = arith.constant 0 : i32
    return %arg0, %c0_i32 : i32, i32
  }
}

</mosaic_0001>

<bundles_post_ra>
// kernel: tpu_custom_call.1
= control target key start
LH: loop header
LB: loop body
LE: loop exit
PB: predicated region body
PF: predicated region fallthrough
CT: control target
= control target key end

     0   :  { %14 = vsyncpa [#allocation3], 0  ;;  %s957_s0 = inlined_call_operand.hbm [shape: f32[16,128], index: 0, kind: input, shape index: {}]   ;;  %s958_s1 = inlined_call_operand.hbm [shape: f32[128,256], index: 1, kind: input, shape index: {}]   ;;  %s959_s2 = inlined_call_operand.vmem [shape: f32[1,256], index: 2, kind: input, shape index: {}]   ;;  %s960_s3 = inlined_call_operand.hbm [shape: f32[256,128], index: 3, kind: input, shape index: {}]   ;;  %s961_s4 = inlined_call_operand.vmem [shape: f32[1,128], index: 4, kind: input, shape index: {}]   ;;  %s962_s5 = inlined_call_operand.hbm [shape: f32[128,128], index: 5, kind: input, shape index: {}]   ;;  %s963_s6 = inlined_call_operand.vmem [shape: f32[1,128], index: 6, kind: input, shape index: {}]   ;;  %s964_s7 = inlined_call_operand.hbm [shape: f32[128,128], index: 7, kind: input, shape index: {}]   ;;  %s965_s8 = inlined_call_operand.vmem [shape: f32[1,128], index: 8, kind: input, shape index: {}]   ;;  %s966_s9 = inlined_call_operand.hbm [shape: f32[16,128], index: 9, kind: output, shape index: {}]  }
   0x1   :  { %15 = vsyncpa [#allocation6], 0 }
   0x2   :  { %16 = vsyncpa [#allocation9], 0 }
   0x3   :  { %17 = vsyncpa [#allocation4], 0  ;;  %s849_s30 = smov [#allocation5]  }
   0x4   :  { %s35_s10 = sshll.u32 %s849_s30, 4  ;;  %s36_s10 = int_to_ptr.vmem [resolvable:$true] %s35_s10 }
   0x5   :  { %s729_s11 = scalar_lea.vmem %s36_s10, 4096  ;;  %p734_p1 = scmp.lt.s32.totalorder %s36_s10, %s36_s10 }
   0x6   :  { %p730_p0 = scmp.ne.s32.totalorder %s36_s10, %s729_s11  ;;  %p735_p2 = scmp.lt.s32.totalorder %s729_s11, %s729_s11 }
   0x8   :  { %p736_p3 = por %p735_p2, %p734_p1 }
   0xa   :  { %p737_p4 = pnand %p736_p3, %p730_p0 }
   0xc   :  { %740 = shalt.err (!%p737_p4)
}
   0xd   :  { %s850_s12 = smov 256   ;;  %s851_s13 = smov 16  }
   0xe   :  { %41 = dma.hbm_to_vmem [thread:$0]  %s958_s1, 4096, %s36_s10, [#allocation6], %s850_s12, %s850_s12, %s851_s13  }
   0xf   :  { %s852_s16 = smov [#allocation8]   ;;  %s853_s18 = smov [#allocation2]  }
  0x10   :  { %s63_s17 = sshll.u32 %s852_s16, 4  ;;  %s23_s19 = sshll.u32 %s853_s18, 4  ;;  %s64_s17 = int_to_ptr.vmem [resolvable:$true] %s63_s17  ;;  %s24_s19 = int_to_ptr.vmem [resolvable:$true] %s23_s19 }
  0x11   :  { %s749_s20 = scalar_lea.vmem %s64_s17, 2048  ;;  %p754_p6 = scmp.lt.s32.totalorder %s64_s17, %s64_s17 }
  0x12   :  { %p750_p5 = scmp.ne.s32.totalorder %s64_s17, %s749_s20  ;;  %p755_p7 = scmp.lt.s32.totalorder %s749_s20, %s749_s20 }
  0x14   :  { %p756_p8 = por %p755_p7, %p754_p6 }
  0x16   :  { %p757_p9 = pnand %p756_p8, %p750_p5 }
  0x18   :  { %760 = shalt.err (!%p757_p9)
}
  0x19   :  { %s854_s21 = smov 128   ;;  %s855_s22 = smov 8  }
  0x1a   :  { %69 = dma.hbm_to_vmem [thread:$0]  %s962_s5, 2048, %s64_s17, [#allocation9], %s854_s21, %s854_s21, %s855_s22  }
  0x1b   :  { %s769_s1 = scalar_lea.vmem %s24_s19, 256  ;;  %p774_p11 = scmp.lt.s32.totalorder %s24_s19, %s24_s19 }
  0x1c   :  { %p770_p10 = scmp.ne.s32.totalorder %s24_s19, %s769_s1  ;;  %p775_p12 = scmp.lt.s32.totalorder %s769_s1, %s769_s1 }
  0x1e   :  { %p776_p13 = por %p775_p12, %p774_p11 }
  0x20   :  { %p777_p0 = pnand %p776_p13, %p770_p10 }
  0x22   :  { %780 = shalt.err (!%p777_p0)
}
  0x23   :  { %29 = dma.hbm_to_vmem [thread:$0]  %s957_s0, 256, %s24_s19, [#allocation3], %s854_s21, %s854_s21, %s855_s22  }
  0x24   :  { %s856_s27 = smov [#allocation7]   ;;  %s857_s29 = smov [#allocation10]  }
  0x25   :  { %s49_s28 = sshll.u32 %s856_s27, 4  ;;  %s77_s5 = sshll.u32 %s857_s29, 4  ;;  %s50_s28 = int_to_ptr.vmem [resolvable:$true] %s49_s28  ;;  %s78_s5 = int_to_ptr.vmem [resolvable:$true] %s77_s5 }
  0x26   :  { %s789_s30 = scalar_lea.vmem %s50_s28, 4096  ;;  %p794_p2 = scmp.lt.s32.totalorder %s50_s28, %s50_s28 }
  0x27   :  { %p790_p1 = scmp.ne.s32.totalorder %s50_s28, %s789_s30  ;;  %p795_p3 = scmp.lt.s32.totalorder %s789_s30, %s789_s30 }
  0x29   :  { %p796_p4 = por %p795_p3, %p794_p2 }
  0x2b   :  { %p797_p5 = pnand %p796_p4, %p790_p1 }
  0x2d   :  { %800 = shalt.err (!%p797_p5)
}
  0x2e   :  { %55 = dma.hbm_to_vmem [thread:$0]  %s960_s3, 4096, %s50_s28, [#allocation6], %s854_s21, %s854_s21, %s855_s22  }
  0x2f   :  { %s809_s0 = scalar_lea.vmem %s78_s5, 2048  ;;  %p814_p7 = scmp.lt.s32.totalorder %s78_s5, %s78_s5 }
  0x30   :  { %p810_p6 = scmp.ne.s32.totalorder %s78_s5, %s809_s0  ;;  %p815_p8 = scmp.lt.s32.totalorder %s809_s0, %s809_s0 }
  0x32   :  { %p816_p9 = por %p815_p8, %p814_p7 }
  0x34   :  { %p817_p10 = pnand %p816_p9, %p810_p6 }
  0x36   :  { %820 = shalt.err (!%p817_p10)
}
  0x37   :  { %83 = dma.hbm_to_vmem [thread:$0]  %s964_s7, 2048, %s78_s5, [#allocation9], %s854_s21, %s854_s21, %s855_s22  }
  0x38   :  { %841 = dma.done.wait [#allocation3], 256  }
  0x39   :  { %842 = vsyncadd [#allocation3], 4294967040 }
  0x3a   :  { %843 = dma.done.wait [#allocation6], 8192  }
  0x3b   :  { %844 = vsyncadd [#allocation6], 4294959104 }
  0x3c   :  { %845 = dma.done.wait [#allocation9], 4096  }
  0x3d   :  { %846 = vsyncadd [#allocation9], 4294963200  ;;  %v858_v0 = vmov 0.0   ;;  %v134_v1 = vld [vmem:[#allocation5 + $0xf8] sm:$0xff]  ;;  %v133_v2 = vld [vmem:[#allocation5 + $0xf0] sm:$0xff]  ;;  %s859_s18 = smov [#allocation11]  }
  0x3e   :  { %211 = vmatprep.mubr.f32.mxu0 %v858_v0  ;;  %v132_v3 = vld [vmem:[#allocation5 + $0xe8] sm:$0xff]  ;;  %147 = vmatprep.subr.mxu0 %v134_v1  ;;  %v131_v4 = vld [vmem:[#allocation5 + $0xe0] sm:$0xff]  ;;  %v130_v5 = vld [vmem:[#allocation5 + $0xd8] sm:$0xff]  ;;  %s549_s19 = sshll.u32 %s859_s18, 4  ;;  %s550_s19 = int_to_ptr.vmem [resolvable:$true] %s549_s19 }
  0x3f   :  { %148 = vmatpush1.msra.mxu0 %v133_v2  ;;  %v129_v6 = vld [vmem:[#allocation5 + $0xd0] sm:$0xff]  ;;  %v128_v7 = vld [vmem:[#allocation5 + $0xc8] sm:$0xff]  ;;  %v127_v8 = vld [vmem:[#allocation5 + $0xc0] sm:$0xff]  ;;  %p826_p12 = scmp.lt.s32.totalorder %s550_s19, %s550_s19 }
  0x40   :  { %149 = vmatprep.subr.mxu0 %v132_v3  ;;  %v126_v9 = vld [vmem:[#allocation5 + $0xb8] sm:$0xff]  ;;  %v125_v10 = vld [vmem:[#allocation5 + $0xb0] sm:$0xff]  ;;  %v124_v11 = vld [vmem:[#allocation5 + $0xa8] sm:$0xff] }
  0x41   :  { %150 = vmatpush1.msra.mxu0 %v131_v4  ;;  %v123_v12 = vld [vmem:[#allocation5 + $0xa0] sm:$0xff]  ;;  %v122_v13 = vld [vmem:[#allocation5 + $0x98] sm:$0xff]  ;;  %v121_v14 = vld [vmem:[#allocation5 + $0x90] sm:$0xff] }
  0x42   :  { %151 = vmatprep.subr.mxu0 %v130_v5  ;;  %v259_v15 = vld [vmem:[#allocation7 + $0xf8] sm:$0xff]  ;;  %v120_v17 = vld [vmem:[#allocation5 + $0x88] sm:$0xff]  ;;  %v258_v18 = vld [vmem:[#allocation7 + $0xf0] sm:$0xff] }
  0x43   :  { %152 = vmatpush1.msra.mxu0 %v129_v6  ;;  %v243_v16 = vld [vmem:[#allocation7 + $0x78] sm:$0xff]  ;;  %566 = vmatprep.subr.mxu1 %v259_v15  ;;  %v242_v19 = vld [vmem:[#allocation7 + $0x70] sm:$0xff]  ;;  %v119_v20 = vld [vmem:[#allocation5 + $0x80] sm:$0xff] }
  0x44   :  { %153 = vmatprep.subr.mxu0 %v128_v7  ;;  %567 = vmatpush3.msra.mxu1 %v243_v16  ;;  %v257_v21 = vld [vmem:[#allocation7 + $0xe8] sm:$0xff]  ;;  %v118_v22 = vld [vmem:[#allocation5 + $0x78] sm:$0xff]  ;;  %v117_v24 = vld [vmem:[#allocation5 + $0x70] sm:$0xff] }
  0x45   :  { %154 = vmatpush1.msra.mxu0 %v127_v8  ;;  %568 = vmatprep.subr.mxu1 %v258_v18  ;;  %v241_v23 = vld [vmem:[#allocation7 + $0x68] sm:$0xff]  ;;  %v256_v25 = vld [vmem:[#allocation7 + $0xe0] sm:$0xff]  ;;  %v255_v29 = vld [vmem:[#allocation7 + $0xd8] sm:$0xff] }
  0x46   :  { %155 = vmatprep.subr.mxu0 %v126_v9  ;;  %569 = vmatpush3.msra.mxu1 %v242_v19  ;;  %v116_v26 = vld [vmem:[#allocation5 + $0x68] sm:$0xff]  ;;  %v240_v27 = vld [vmem:[#allocation7 + $0x60] sm:$0xff]  ;;  %v114_v30 = vld [vmem:[#allocation5 + $0x58] sm:$0xff] }
  0x47   :  { %156 = vmatpush1.msra.mxu0 %v125_v10  ;;  %570 = vmatprep.subr.mxu1 %v257_v21  ;;  %v115_v28 = vld [vmem:[#allocation5 + $0x60] sm:$0xff]  ;;  %v239_v31 = vld [vmem:[#allocation7 + $0x58] sm:$0xff]  ;;  %v113_v32 = vld [vmem:[#allocation5 + $0x50] sm:$0xff] }
  0x48   :  { %157 = vmatprep.subr.mxu0 %v124_v11  ;;  %571 = vmatpush3.msra.mxu1 %v241_v23  ;;  %v254_v33 = vld [vmem:[#allocation7 + $0xd0] sm:$0xff]  ;;  %v112_v34 = vld [vmem:[#allocation5 + $0x48] sm:$0xff]  ;;  %v111_v36 = vld [vmem:[#allocation5 + $0x40] sm:$0xff] }
  0x49   :  { %158 = vmatpush1.msra.mxu0 %v123_v12  ;;  %572 = vmatprep.subr.mxu1 %v256_v25  ;;  %v238_v35 = vld [vmem:[#allocation7 + $0x50] sm:$0xff]  ;;  %v253_v37 = vld [vmem:[#allocation7 + $0xc8] sm:$0xff]  ;;  %v110_v38 = vld [vmem:[#allocation5 + $0x38] sm:$0xff] }
  0x4a   :  { %159 = vmatprep.subr.mxu0 %v122_v13  ;;  %573 = vmatpush3.msra.mxu1 %v240_v27  ;;  %v237_v39 = vld [vmem:[#allocation7 + $0x48] sm:$0xff]  ;;  %v109_v40 = vld [vmem:[#allocation5 + $0x30] sm:$0xff]  ;;  %v252_v41 = vld [vmem:[#allocation7 + $0xc0] sm:$0xff]  ;;  %v137_v13 = vlaneseq }
  0x4b   :  { %160 = vmatpush1.msra.mxu0 %v121_v14  ;;  %574 = vmatprep.subr.mxu1 %v255_v29  ;;  %v108_v42 = vld [vmem:[#allocation5 + $0x28] sm:$0xff]  ;;  %v236_v43 = vld [vmem:[#allocation7 + $0x40] sm:$0xff]  ;;  %v251_v45 = vld [vmem:[#allocation7 + $0xb8] sm:$0xff] }
  0x4c   :  { %161 = vmatprep.subr.mxu0 %v120_v17  ;;  %575 = vmatpush3.msra.mxu1 %v239_v31  ;;  %v107_v44 = vld [vmem:[#allocation5 + $0x20] sm:$0xff]  ;;  %v106_v46 = vld [vmem:[#allocation5 + $0x18] sm:$0xff]  ;;  %v105_v48 = vld [vmem:[#allocation5 + $0x10] sm:$0xff]  ;;  %v138_v14 = vshrl.u32 %v137_v13, 7 }
  0x4d   :  { %162 = vmatpush1.msra.mxu0 %v119_v20  ;;  %576 = vmatprep.subr.mxu1 %v254_v33  ;;  %v235_v47 = vld [vmem:[#allocation7 + $0x38] sm:$0xff]  ;;  %v250_v49 = vld [vmem:[#allocation7 + $0xb0] sm:$0xff]  ;;  %v104_v50 = vld [vmem:[#allocation5 + $0x8] sm:$0xff] }
  0x4e   :  { %163 = vmatprep.subr.mxu0 %v118_v22  ;;  %577 = vmatpush3.msra.mxu1 %v238_v35  ;;  %v234_v51 = vld [vmem:[#allocation7 + $0x30] sm:$0xff]  ;;  %v103_v52 = vld [vmem:[#allocation5] sm:$0xff]  ;;  %v249_v53 = vld [vmem:[#allocation7 + $0xa8] sm:$0xff]  ;;  %v139_v15 = vsub.s32 0, %v138_v14  ;;  %v143_v17 = vsub.s32 1, %v138_v14 }
  0x4f   :  { %164 = vmatpush1.msra.mxu0 %v117_v24  ;;  %578 = vmatprep.subr.mxu1 %v253_v37  ;;  %v101_v54 = vld [vmem:[#allocation2] sm:$0xff]  ;;  %v233_v55 = vld [vmem:[#allocation7 + $0x28] sm:$0xff]  ;;  %v248_v56 = vld [vmem:[#allocation7 + $0xa0] sm:$0xff] }
  0x50   :  { %165 = vmatprep.subr.mxu0 %v116_v26  ;;  %579 = vmatpush3.msra.mxu1 %v237_v39  ;;  %v232_v57 = vld [vmem:[#allocation7 + $0x20] sm:$0xff]  ;;  %v102_v58 = vld [vmem:[#allocation2 + $0x8] sm:$0xff]  ;;  %v246_v61 = vld [vmem:[#allocation7 + $0x90] sm:$0xff] }
  0x51   :  { %166 = vmatpush1.msra.mxu0 %v115_v28  ;;  %580 = vmatprep.subr.mxu1 %v252_v41  ;;  %v247_v59 = vld [vmem:[#allocation7 + $0x98] sm:$0xff]  ;;  %v230_v62 = vld [vmem:[#allocation7 + $0x10] sm:$0xff]  ;;  %v245_v63 = vld [vmem:[#allocation7 + $0x88] sm:$0xff] }
  0x52   :  { %167 = vmatprep.subr.mxu0 %v114_v30  ;;  %581 = vmatpush3.msra.mxu1 %v236_v43  ;;  %v231_v60 = vld [vmem:[#allocation7 + $0x18] sm:$0xff]  ;;  %v229_v1 = vld [vmem:[#allocation7 + $0x8] sm:$0xff]  ;;  %v244_v2 = vld [vmem:[#allocation7 + $0x80] sm:$0xff] }
  0x53   :  { %168 = vmatpush1.msra.mxu0 %v113_v32  ;;  %582 = vmatprep.subr.mxu1 %v251_v45  ;;  %v228_v3 = vld [vmem:[#allocation7] sm:$0xff]  ;;  %v358_v4 = vld [vmem:[#allocation8 + $0x70] sm:$0xff]  ;;  %v357_v5 = vld [vmem:[#allocation8 + $0x68] sm:$0xff] }
  0x54   :  { %169 = vmatprep.subr.mxu0 %v112_v34  ;;  %583 = vmatpush3.msra.mxu1 %v235_v47  ;;  %v356_v6 = vld [vmem:[#allocation8 + $0x60] sm:$0xff]  ;;  %v355_v7 = vld [vmem:[#allocation8 + $0x58] sm:$0xff]  ;;  %v354_v8 = vld [vmem:[#allocation8 + $0x50] sm:$0xff] }
  0x55   :  { %170 = vmatpush1.msra.mxu0 %v111_v36  ;;  %584 = vmatprep.subr.mxu1 %v250_v49  ;;  %v353_v9 = vld [vmem:[#allocation8 + $0x48] sm:$0xff]  ;;  %v352_v10 = vld [vmem:[#allocation8 + $0x40] sm:$0xff]  ;;  %v351_v11 = vld [vmem:[#allocation8 + $0x38] sm:$0xff] }
  0x56   :  { %171 = vmatprep.subr.mxu0 %v110_v38  ;;  %585 = vmatpush3.msra.mxu1 %v234_v51  ;;  %v350_v12 = vld [vmem:[#allocation8 + $0x30] sm:$0xff]  ;;  %v349_v32 = vld [vmem:[#allocation8 + $0x28] sm:$0xff]  ;;  %v348_v33 = vld [vmem:[#allocation8 + $0x20] sm:$0xff] }
  0x57   :  { %172 = vmatpush1.msra.mxu0 %v109_v40  ;;  %586 = vmatprep.subr.mxu1 %v249_v53  ;;  %v135_v16 = vld [vmem:[%s959_s2] sm:$0x3]  ;;  %v347_v34 = vld [vmem:[#allocation8 + $0x18] sm:$0xff]  ;;  %v345_v36 = vld [vmem:[#allocation8 + $0x8] sm:$0xff] }
  0x58   :  { %173 = vmatprep.subr.mxu0 %v108_v42  ;;  %587 = vmatpush3.msra.mxu1 %v233_v55  ;;  %v140_v18 = vrot.slane %v135_v16, %v139_v15  ;;  %v144_v19 = vrot.slane %v135_v16, %v143_v17  ;;  %v346_v35 = vld [vmem:[#allocation8 + $0x10] sm:$0xff]  ;;  %v344_v37 = vld [vmem:[#allocation8] sm:$0xff]  ;;  %v459_v38 = vld [vmem:[#allocation10 + $0x78] sm:$0xff] }
  0x59   :  { %174 = vmatpush1.msra.mxu0 %v107_v44  ;;  %588 = vmatprep.subr.mxu1 %v248_v56  ;;  %v458_v39 = vld [vmem:[#allocation10 + $0x70] sm:$0xff]  ;;  %v457_v40 = vld [vmem:[#allocation10 + $0x68] sm:$0xff]  ;;  %v456_v41 = vld [vmem:[#allocation10 + $0x60] sm:$0xff] }
  0x5a   :  { %175 = vmatprep.subr.mxu0 %v106_v46  ;;  %589 = vmatpush3.msra.mxu1 %v232_v57  ;;  %v455_v42 = vld [vmem:[#allocation10 + $0x58] sm:$0xff]  ;;  %v454_v43 = vld [vmem:[#allocation10 + $0x50] sm:$0xff]  ;;  %v453_v44 = vld [vmem:[#allocation10 + $0x48] sm:$0xff] }
  0x5b   :  { %176 = vmatpush1.msra.mxu0 %v105_v48  ;;  %590 = vmatprep.subr.mxu1 %v247_v59  ;;  %v452_v45 = vld [vmem:[#allocation10 + $0x40] sm:$0xff]  ;;  %v451_v46 = vld [vmem:[#allocation10 + $0x38] sm:$0xff]  ;;  %v450_v47 = vld [vmem:[#allocation10 + $0x30] sm:$0xff] }
  0x5c   :  { %177 = vmatprep.subr.mxu0 %v104_v50  ;;  %591 = vmatpush3.msra.mxu1 %v231_v60  ;;  %v449_v48 = vld [vmem:[#allocation10 + $0x28] sm:$0xff]  ;;  %v448_v49 = vld [vmem:[#allocation10 + $0x20] sm:$0xff]  ;;  %v563_v51 = vld [vmem:[%s961_s4] ss:$0 sm:$0xff] }
  0x5d   :  { %178 = vmatpush1.msra.mxu0 %v103_v52  ;;  %592 = vmatprep.subr.mxu1 %v246_v61  ;;  %v447_v61 = vld [vmem:[#allocation10 + $0x18] sm:$0xff] }
  0x5e   :  { %212 = vmatmul.mubr.f32.vlgmr.msra.gmra.mxu0 %v101_v54  ;;  %593 = vmatpush3.msra.mxu1 %v230_v62  ;;  %v446_v62 = vld [vmem:[#allocation10 + $0x10] sm:$0xff] }
  0x5f   :  { %217 = vmatprep.mubr.f32.mxu0 %v858_v0  ;;  %594 = vmatprep.subr.mxu1 %v245_v63  ;;  %v359_v0 = vld [vmem:[#allocation8 + $0x78] sm:$0xff]  ;;  %v445_v63 = vld [vmem:[#allocation10 + $0x8] sm:$0xff] }
  0x60   :  { %595 = vmatpush3.msra.mxu1 %v229_v1  ;;  %640 = vmatprep.subr.mxu0 %v359_v0  ;;  %v444_v1 = vld [vmem:[#allocation10] sm:$0xff] }
  0x61   :  { %596 = vmatprep.subr.mxu1 %v244_v2  ;;  %641 = vmatpush3.msra.mxu0 %v359_v0  ;;  %v564_v2 = vld [vmem:[%s963_s6] ss:$0 sm:$0xff]  ;;  %s821_s6 = scalar_lea.vmem %s550_s19, 256 }
  0x62   :  { %218 = vmatmul.mubr.f32.gmra.mxu0 %v102_v58  ;;  %597 = vmatpush3.msra.mxu1 %v228_v3  ;;  %p822_p11 = scmp.ne.s32.totalorder %s550_s19, %s821_s6  ;;  %p827_p13 = scmp.lt.s32.totalorder %s821_s6, %s821_s6 }
  0x63   :  { %642 = vmatprep.subr.mxu0 %v358_v4  ;;  %675 = vmatprep.subr.mxu1 %v459_v38 }
  0x64   :  { %643 = vmatpush3.msra.mxu0 %v358_v4  ;;  %p828_p0 = por %p827_p13, %p826_p12 }
  0x65   :  { %644 = vmatprep.subr.mxu0 %v357_v5 }
  0x66   :  { %645 = vmatpush3.msra.mxu0 %v357_v5  ;;  %p829_p1 = pnand %p828_p0, %p822_p11 }
  0x67   :  { %646 = vmatprep.subr.mxu0 %v356_v6 }
  0x68   :  { %647 = vmatpush3.msra.mxu0 %v356_v6 }
  0x69   :  { %648 = vmatprep.subr.mxu0 %v355_v7 }
  0x6a   :  { %649 = vmatpush3.msra.mxu0 %v355_v7 }
  0x6b   :  { %650 = vmatprep.subr.mxu0 %v354_v8 }
  0x6c   :  { %651 = vmatpush3.msra.mxu0 %v354_v8  ;;  %v565_v8 = vld [vmem:[%s965_s8] ss:$0 sm:$0xff] }
  0x6d   :  { %652 = vmatprep.subr.mxu0 %v353_v9 }
  0x6e   :  { %653 = vmatpush3.msra.mxu0 %v353_v9 }
  0x6f   :  { %654 = vmatprep.subr.mxu0 %v352_v10 }
  0x70   :  { %655 = vmatpush3.msra.mxu0 %v352_v10 }
  0x71   :  { %656 = vmatprep.subr.mxu0 %v351_v11 }
  0x72   :  { %657 = vmatpush3.msra.mxu0 %v351_v11 }
  0x73   :  { %658 = vmatprep.subr.mxu0 %v350_v12 }
  0x74   :  { %659 = vmatpush3.msra.mxu0 %v350_v12 }
  0x75   :  { %660 = vmatprep.subr.mxu0 %v349_v32 }
  0x76   :  { %661 = vmatpush3.msra.mxu0 %v349_v32 }
  0x77   :  { %662 = vmatprep.subr.mxu0 %v348_v33 }
  0x78   :  { %663 = vmatpush3.msra.mxu0 %v348_v33 }
  0x79   :  { %664 = vmatprep.subr.mxu0 %v347_v34 }
  0x7a   :  { %665 = vmatpush3.msra.mxu0 %v347_v34 }
  0x7b   :  { %666 = vmatprep.subr.mxu0 %v346_v35 }
  0x7c   :  { %667 = vmatpush3.msra.mxu0 %v346_v35 }
  0x7d   :  { %668 = vmatprep.subr.mxu0 %v345_v36 }
  0x7e   :  { %669 = vmatpush3.msra.mxu0 %v345_v36 }
  0x7f   :  { %670 = vmatprep.subr.mxu0 %v344_v37 }
  0x80   :  { %671 = vmatpush3.msra.mxu0 %v344_v37 }
 0x11e   :  { %v213_v20 = vpop.f32.mrf.mxu0 }
 0x11f   :  { %v214_v21 = vadd.f32 %v213_v20, %v140_v18 }
 0x120   :  { %v215_v22 = vpop.f32.mrf.mxu0 }
 0x121   :  { %v216_v23 = vadd.f32 %v215_v22, %v144_v19  ;;  %v224_v26 = vmax.f32 %v214_v21, 0.0 }
 0x122   :  { %v219_v24 = vpop.f32.mrf.mxu0 }
 0x123   :  { %v225_v25 = vmax.f32 %v216_v23, 0.0  ;;  %v220_v27 = vadd.f32 %v219_v24, %v140_v18 }
 0x124   :  { %v221_v28 = vpop.f32.mrf.mxu0 }
 0x125   :  { %v222_v29 = vadd.f32 %v221_v28, %v144_v19  ;;  %331 = vmatprep.mubr.f32.mxu1 %v225_v25  ;;  %v226_v31 = vmax.f32 %v220_v27, 0.0 }
 0x126   :  { %332 = vmatmul.mubr.f32.vlgmr.msra.gmra.mxu1 %v224_v26 }
 0x127   :  { %v227_v30 = vmax.f32 %v222_v29, 0.0  ;;  %676 = vmatpush3.msra.mxu1 %v459_v38 }
 0x128   :  { %677 = vmatprep.subr.mxu1 %v458_v39 }
 0x129   :  { %336 = vmatprep.mubr.f32.mxu1 %v227_v30  ;;  %678 = vmatpush3.msra.mxu1 %v458_v39 }
 0x12a   :  { %337 = vmatmul.mubr.f32.gmra.mxu1 %v226_v31  ;;  %679 = vmatprep.subr.mxu1 %v457_v40 }
 0x12b   :  { %680 = vmatpush3.msra.mxu1 %v457_v40 }
 0x12c   :  { %681 = vmatprep.subr.mxu1 %v456_v41 }
 0x12d   :  { %682 = vmatpush3.msra.mxu1 %v456_v41 }
 0x12e   :  { %683 = vmatprep.subr.mxu1 %v455_v42 }
 0x12f   :  { %684 = vmatpush3.msra.mxu1 %v455_v42 }
 0x130   :  { %685 = vmatprep.subr.mxu1 %v454_v43 }
 0x131   :  { %686 = vmatpush3.msra.mxu1 %v454_v43 }
 0x132   :  { %687 = vmatprep.subr.mxu1 %v453_v44 }
 0x133   :  { %688 = vmatpush3.msra.mxu1 %v453_v44 }
 0x134   :  { %689 = vmatprep.subr.mxu1 %v452_v45 }
 0x135   :  { %690 = vmatpush3.msra.mxu1 %v452_v45 }
 0x136   :  { %691 = vmatprep.subr.mxu1 %v451_v46 }
 0x137   :  { %692 = vmatpush3.msra.mxu1 %v451_v46 }
 0x138   :  { %693 = vmatprep.subr.mxu1 %v450_v47 }
 0x139   :  { %694 = vmatpush3.msra.mxu1 %v450_v47 }
 0x13a   :  { %695 = vmatprep.subr.mxu1 %v449_v48 }
 0x13b   :  { %696 = vmatpush3.msra.mxu1 %v449_v48 }
 0x13c   :  { %697 = vmatprep.subr.mxu1 %v448_v49 }
 0x13d   :  { %698 = vmatpush3.msra.mxu1 %v448_v49 }
 0x13e   :  { %699 = vmatprep.subr.mxu1 %v447_v61 }
 0x13f   :  { %700 = vmatpush3.msra.mxu1 %v447_v61 }
 0x140   :  { %701 = vmatprep.subr.mxu1 %v446_v62 }
 0x141   :  { %702 = vmatpush3.msra.mxu1 %v446_v62 }
 0x142   :  { %703 = vmatprep.subr.mxu1 %v445_v63 }
 0x143   :  { %704 = vmatpush3.msra.mxu1 %v445_v63 }
 0x144   :  { %705 = vmatprep.subr.mxu1 %v444_v1 }
 0x145   :  { %706 = vmatpush3.msra.mxu1 %v444_v1 }
 0x1e6   :  { %v598_v50 = vpop.f32.mrf.mxu1 }
 0x1e8   :  { %v599_v52 = vpop.f32.mrf.mxu1 }
 0x1e9   :  { %v600_v53 = vadd.f32 %v599_v52, %v598_v50 }
 0x1ea   :  { %v601_v54 = vpop.f32.mrf.mxu1 }
 0x1eb   :  { %v334_v55 = vadd.f32 %v600_v53, %v563_v51 }
 0x1ec   :  { %v602_v56 = vpop.f32.mrf.mxu1 }
 0x1ed   :  { %v342_v57 = vmax.f32 %v334_v55, 0.0  ;;  %v603_v58 = vadd.f32 %v602_v56, %v601_v54 }
 0x1ef   :  { %v339_v59 = vadd.f32 %v603_v58, %v563_v51  ;;  %672 = vmatprep.mubr.f32.mxu0 %v342_v57 }
 0x1f1   :  { %v343_v60 = vmax.f32 %v339_v59, 0.0 }
 0x1f3   :  { %673 = vmatmul.mubr.f32.vlgmr.msra.gmra.mxu0 %v343_v60 }
 0x2b3   :  { %v674_v3 = vpop.f32.mrf.mxu0 }
 0x2b4   :  { %v439_v0 = vadd.f32 %v674_v3, %v564_v2 }
 0x2b5   :  { %v433_v4 = vpop.f32.mrf.mxu0 }
 0x2b6   :  { %v434_v5 = vadd.f32 %v564_v2, %v433_v4  ;;  %v443_v7 = vmax.f32 %v439_v0, 0.0 }
 0x2b8   :  { %v442_v6 = vmax.f32 %v434_v5, 0.0 }
 0x2ba   :  { %707 = vmatprep.mubr.f32.mxu1 %v442_v6 }
 0x2bb   :  { %708 = vmatmul.mubr.f32.vlgmr.msra.gmra.mxu1 %v443_v7 }
 0x37b   :  { %v709_v9 = vpop.f32.mrf.mxu1 }
 0x37c   :  { %v539_v10 = vadd.f32 %v709_v9, %v565_v8 }
 0x37d   :  { %v533_v11 = vpop.f32.mrf.mxu1 }
 0x37e   :  { %543 = vst [vmem:[#allocation11 + $0x8] sm:$0xff] %v539_v10  ;;  %v534_v12 = vadd.f32 %v565_v8, %v533_v11 }
 0x380   :  { %542 = vst [vmem:[#allocation11] sm:$0xff] %v534_v12 }
 0x381   :  { %832 = shalt.err (!%p829_p1)
}
 0x382   :  { %555 = dma.vmem_to_hbm [thread:$0]  %s550_s19, 256, %s966_s9, [#allocation4], %s854_s21, %s854_s21, %s855_s22  }
 0x383   :  { %847 = dma.done.wait [#allocation4], 256  }
 0x384   :  { %848 = vsyncadd [#allocation4], 4294967040 }
 0x385   :  { %559 = vsyncpa [#allocation3], 1 }
 0x386   :  { %560 = vsyncpa [#allocation6], 1 }
 0x387   :  { %561 = vsyncpa [#allocation9], 1 }
 0x388   :  { %562 = vsyncpa [#allocation4], 1 }

</bundles_post_ra>
